<compile_context>
chip_gen: v7x
topology: tpu7x:2x2x1
jax: 0.10.0
libtpu: 0.0.40
codegen_flags: <defaults>
</compile_context>

<pallas_src>
import functools
import math

import jax
import jax.numpy as jnp
from jax.experimental import pallas as pl
from jax.experimental.pallas import tpu as pltpu

# Feature sizes fixed by the PyTorch module.
IN_F, H1_F, H2_F, OUT_F = 3, 128, 64, 1

# Default batch tile: multiple of 128 lanes.  Per-tile VMEM footprint is
# ~0.9 KiB per batch element (x/out double buffers + f32 h1/h2 temporaries),
# so 8192 -> ~7.5 MiB, comfortably inside the 32 MiB scoped limit requested
# below and safe on v7x's 64 MiB physical VMEM.
DEFAULT_TILE_B = 8192


def actor_kernel(x_ref, w1_ref, b1_ref, w2_ref, b2_ref, w3_ref, b3_ref, o_ref,
                 *, mxu_dtype):
    """One batch tile; layout is (features, batch) so batch is the lane axis."""
    f32 = jnp.float32
    x = x_ref[...].astype(f32)          # (3, TILE_B)
    w1 = w1_ref[...].astype(f32)        # (128, 3)

    # fc1 (K=3): three VPU broadcast-FMAs -- a (B,3)x(3,128) matmul would use
    # <3% of the MXU K dimension, so keep it off the MXU entirely.
    h1 = (w1[:, 0:1] * x[0:1, :]
          + w1[:, 1:2] * x[1:2, :]
          + w1[:, 2:3] * x[2:3, :]
          + b1_ref[...])                # (128, TILE_B)
    h1 = jnp.maximum(h1, 0.0)

    # fc2 (128 -> 64): the only well-shaped matmul; MXU with (optionally bf16)
    # operands and f32 accumulation.  Bias add / ReLU stay f32 on the VPU.
    h2 = jnp.dot(w2_ref[...], h1.astype(mxu_dtype),
                 preferred_element_type=f32) + b2_ref[...]
    h2 = jnp.maximum(h2, 0.0)           # (64, TILE_B)

    # fc_mu (N=1): elementwise multiply + cross-sublane reduction (XLU slot)
    # instead of an MXU matmul that would light up a single output lane.
    mu = jnp.sum(h2 * w3_ref[...], axis=0, keepdims=True) + b3_ref[0, 0]
    o_ref[...] = (jnp.tanh(mu) * 2.0).astype(o_ref.dtype)   # (1, TILE_B) lane-dense


def actor_forward(x, params, *, tile_b=DEFAULT_TILE_B, use_bf16=True):
    """x: (B, 3) -> (B, 1).  Weights in PyTorch (out, in) orientation."""
    w1, b1, w2, b2, w3, b3 = params
    B = x.shape[0]

    # Clamp the tile for small batches; keep it a multiple of 128 lanes.
    tile_b = min(tile_b, max(128, pl.cdiv(B, 128) * 128))
    num_tiles = pl.cdiv(B, tile_b)
    padded_b = num_tiles * tile_b

    # Lane-major layout: (features, batch).  Padding columns are zeros and
    # their outputs are sliced away below.
    xt = jnp.zeros((IN_F, padded_b), jnp.float32).at[:, :B].set(x.T)
    mxu_dtype = jnp.bfloat16 if use_bf16 else jnp.float32
    if use_bf16:
        xt = xt.astype(jnp.bfloat16)        # halves x HBM traffic on big batches
    w2_in = w2.astype(mxu_dtype)

    flops = 2 * padded_b * (IN_F * H1_F + H1_F * H2_F + H2_F * OUT_F)
    param_bytes = sum(int(p.size) * p.dtype.itemsize
                      for p in (w1, b1, w2_in, b2, w3, b3))
    bytes_accessed = (IN_F * padded_b * xt.dtype.itemsize   # x
                      + padded_b * 4                        # out
                      + param_bytes)

    resident = lambda i: (0, 0)   # weights/biases: same block every grid step

    out = pl.pallas_call(
        functools.partial(actor_kernel, mxu_dtype=mxu_dtype),
        grid=(num_tiles,),
        in_specs=[
            pl.BlockSpec((IN_F, tile_b), lambda i: (0, i)),      # x tile
            pl.BlockSpec((H1_F, IN_F), resident),                # w1 (128, 3)
            pl.BlockSpec((H1_F, 1), resident),                   # b1 (128, 1)
            pl.BlockSpec((H2_F, H1_F), resident),                # w2 (64, 128)
            pl.BlockSpec((H2_F, 1), resident),                   # b2 (64, 1)
            pl.BlockSpec((H2_F, 1), resident),                   # w3 (64, 1)
            pl.BlockSpec(memory_space=pltpu.MemorySpace.SMEM),   # b3 (1, 1) scalar
        ],
        out_specs=pl.BlockSpec((1, tile_b), lambda i: (0, i)),
        out_shape=jax.ShapeDtypeStruct((1, padded_b), jnp.float32),
        compiler_params=pltpu.CompilerParams(
            dimension_semantics=("parallel",),          # megacore / v7x dual-TC
            vmem_limit_bytes=32 * 1024 * 1024),
        cost_estimate=pl.CostEstimate(flops=flops, transcendentals=padded_b,
                                      bytes_accessed=bytes_accessed),
    )(xt, w1, b1, w2_in, b2, w3, b3)

    return out[0, :B].reshape(B, 1)


def init_params(key):
    """PyTorch nn.Linear default init: U(-1/sqrt(fan_in), 1/sqrt(fan_in)) for
    weight and bias.  Weights kept in PyTorch (out, in) orientation; biases as
    column vectors; fc_mu weight stored as a (64, 1) column for the reduction."""
    def linear(key, fan_in, fan_out):
        kw, kb = jax.random.split(key)
        bound = 1.0 / math.sqrt(fan_in)
        w = jax.random.uniform(kw, (fan_out, fan_in), jnp.float32, -bound, bound)
        b = jax.random.uniform(kb, (fan_out, 1), jnp.float32, -bound, bound)
        return w, b

    k1, k2, k3 = jax.random.split(key, 3)
    w1, b1 = linear(k1, IN_F, H1_F)      # (128, 3), (128, 1)
    w2, b2 = linear(k2, H1_F, H2_F)      # (64, 128), (64, 1)
    w3t, b3 = linear(k3, H2_F, OUT_F)    # (1, 64),  (1, 1)
    return (w1, b1, w2, b2, w3t.T, b3)   # w3 stored as (64, 1)


def actor_ref(x, params):
    """Pure-JAX reference matching the PyTorch forward."""
    w1, b1, w2, b2, w3, b3 = params
    h1 = jnp.maximum(x @ w1.T + b1.T, 0.0)
    h2 = jnp.maximum(h1 @ w2.T + b2.T, 0.0)
    return jnp.tanh(h2 @ w3 + b3) * 2.0


if __name__ == "__main__":
    key = jax.random.PRNGKey(0)
    kp, kx = jax.random.split(key)

    params = init_params(kp)
    # State dim 3 (e.g. Pendulum-v1); small batch for the correctness check.
    # NOTE: at B=8 the kernel is launch-overhead dominated -- intended use is
    # large batched rollouts (tile_b up to 8192), amortizing the call cost.
    B = 8
    x = jax.random.normal(kx, (B, 3), jnp.float32)
    ref = actor_ref(x, params)

    out_f32 = actor_forward(x, params, use_bf16=False)
    jax.block_until_ready(out_f32)
    assert out_f32.shape == (B, 1)
    assert jnp.allclose(out_f32, ref, atol=1e-4, rtol=1e-4)

    out_bf16 = actor_forward(x, params, use_bf16=True)   # bf16 MXU operands
    jax.block_until_ready(out_bf16)
    assert jnp.allclose(out_bf16, ref, atol=1e-2, rtol=1e-2)

    print("KERNEL_OK")
</pallas_src>

<mosaic_0001>
module attributes {stable_mosaic.version = 11 : i64} {
  func.func @actor_kernel(%arg0: i32, %arg1: memref<3x128xf32, #tpu.memory_space<vmem>>, %arg2: memref<128x3xf32, #tpu.memory_space<vmem>>, %arg3: memref<128x1xf32, #tpu.memory_space<vmem>>, %arg4: memref<64x128xf32, #tpu.memory_space<vmem>>, %arg5: memref<64x1xf32, #tpu.memory_space<vmem>>, %arg6: memref<64x1xf32, #tpu.memory_space<vmem>>, %arg7: memref<1x1xf32, #tpu.memory_space<smem>>, %arg8: memref<1x128xf32, #tpu.memory_space<vmem>>) attributes {dimension_semantics = [#tpu.dimension_semantics<parallel>], iteration_bounds = array<i64: 1>, scalar_prefetch = 0 : i64, scratch_operands = 0 : i64, tpu.core_type = #tpu.core_type<tc>, window_params = [{transform_indices = @transform_0, window_bounds = array<i64: 3, 128>}, {pipeline_mode = #tpu.pipeline_mode<synchronous>, transform_indices = @transform_1, window_bounds = array<i64: 128, 3>}, {pipeline_mode = #tpu.pipeline_mode<synchronous>, transform_indices = @transform_2, window_bounds = array<i64: 128, 1>}, {pipeline_mode = #tpu.pipeline_mode<synchronous>, transform_indices = @transform_3, window_bounds = array<i64: 64, 128>}, {pipeline_mode = #tpu.pipeline_mode<synchronous>, transform_indices = @transform_4, window_bounds = array<i64: 64, 1>}, {pipeline_mode = #tpu.pipeline_mode<synchronous>, transform_indices = @transform_5, window_bounds = array<i64: 64, 1>}, {transform_indices = @transform_6, window_bounds = array<i64: 1, 1>}, {transform_indices = @transform_7, window_bounds = array<i64: 1, 128>}]} {
    %c0 = arith.constant 0 : index
    %c0_0 = arith.constant 0 : index
    %0 = vector.load %arg1[%c0, %c0_0] : memref<3x128xf32, #tpu.memory_space<vmem>>, vector<3x128xf32>
    %c0_1 = arith.constant 0 : index
    %c0_2 = arith.constant 0 : index
    %1 = vector.load %arg2[%c0_1, %c0_2] : memref<128x3xf32, #tpu.memory_space<vmem>>, vector<128x3xf32>
    %2 = vector.extract_strided_slice %1 {offsets = [0, 0], sizes = [128, 1], strides = [1, 1]} : vector<128x3xf32> to vector<128x1xf32>
    %3 = vector.extract_strided_slice %0 {offsets = [0, 0], sizes = [1, 128], strides = [1, 1]} : vector<3x128xf32> to vector<1x128xf32>
    %4 = vector.broadcast %2 : vector<128x1xf32> to vector<128x128xf32>
    %5 = vector.broadcast %3 : vector<1x128xf32> to vector<128x128xf32>
    %6 = arith.mulf %4, %5 : vector<128x128xf32>
    %7 = vector.extract_strided_slice %1 {offsets = [0, 1], sizes = [128, 1], strides = [1, 1]} : vector<128x3xf32> to vector<128x1xf32>
    %8 = vector.extract_strided_slice %0 {offsets = [1, 0], sizes = [1, 128], strides = [1, 1]} : vector<3x128xf32> to vector<1x128xf32>
    %9 = vector.broadcast %7 : vector<128x1xf32> to vector<128x128xf32>
    %10 = vector.broadcast %8 : vector<1x128xf32> to vector<128x128xf32>
    %11 = arith.mulf %9, %10 : vector<128x128xf32>
    %12 = arith.addf %6, %11 : vector<128x128xf32>
    %13 = vector.extract_strided_slice %1 {offsets = [0, 2], sizes = [128, 1], strides = [1, 1]} : vector<128x3xf32> to vector<128x1xf32>
    %14 = vector.extract_strided_slice %0 {offsets = [2, 0], sizes = [1, 128], strides = [1, 1]} : vector<3x128xf32> to vector<1x128xf32>
    %15 = vector.broadcast %13 : vector<128x1xf32> to vector<128x128xf32>
    %16 = vector.broadcast %14 : vector<1x128xf32> to vector<128x128xf32>
    %17 = arith.mulf %15, %16 : vector<128x128xf32>
    %18 = arith.addf %12, %17 : vector<128x128xf32>
    %c0_3 = arith.constant 0 : index
    %c0_4 = arith.constant 0 : index
    %19 = vector.load %arg3[%c0_3, %c0_4] : memref<128x1xf32, #tpu.memory_space<vmem>>, vector<128x1xf32>
    %20 = vector.broadcast %19 : vector<128x1xf32> to vector<128x128xf32>
    %21 = arith.addf %18, %20 : vector<128x128xf32>
    %cst = arith.constant 0.000000e+00 : f32
    %22 = vector.broadcast %cst : f32 to vector<128x128xf32>
    %23 = arith.maximumf %21, %22 : vector<128x128xf32>
    %c0_5 = arith.constant 0 : index
    %c0_6 = arith.constant 0 : index
    %24 = vector.load %arg4[%c0_5, %c0_6] : memref<64x128xf32, #tpu.memory_space<vmem>>, vector<64x128xf32>
    %cst_7 = arith.constant dense<0.000000e+00> : vector<64x128xf32>
    %25 = tpu.matmul %24, %23, %cst_7 {dimension_numbers = #tpu.dot_dimension_numbers<[1], [0], [0], [1], [0, 0, 1, 1], [], []>} : vector<64x128xf32>, vector<128x128xf32>, vector<64x128xf32> -> vector<64x128xf32>
    %c0_8 = arith.constant 0 : index
    %c0_9 = arith.constant 0 : index
    %26 = vector.load %arg5[%c0_8, %c0_9] : memref<64x1xf32, #tpu.memory_space<vmem>>, vector<64x1xf32>
    %27 = vector.broadcast %26 : vector<64x1xf32> to vector<64x128xf32>
    %28 = arith.addf %25, %27 : vector<64x128xf32>
    %cst_10 = arith.constant 0.000000e+00 : f32
    %29 = vector.broadcast %cst_10 : f32 to vector<64x128xf32>
    %30 = arith.maximumf %28, %29 : vector<64x128xf32>
    %c0_11 = arith.constant 0 : index
    %c0_12 = arith.constant 0 : index
    %31 = vector.load %arg6[%c0_11, %c0_12] : memref<64x1xf32, #tpu.memory_space<vmem>>, vector<64x1xf32>
    %32 = vector.broadcast %31 : vector<64x1xf32> to vector<64x128xf32>
    %33 = arith.mulf %30, %32 : vector<64x128xf32>
    %cst_13 = arith.constant dense<0.000000e+00> : vector<128xf32>
    %34 = vector.multi_reduction <add>, %33, %cst_13 [0] : vector<64x128xf32> to vector<128xf32>
    %35 = vector.shape_cast %34 : vector<128xf32> to vector<1x128xf32>
    %c0_14 = arith.constant 0 : index
    %c0_15 = arith.constant 0 : index
    %36 = memref.load %arg7[%c0_14, %c0_15] : memref<1x1xf32, #tpu.memory_space<smem>>
    %37 = vector.broadcast %36 : f32 to vector<1x128xf32>
    %38 = arith.addf %35, %37 : vector<1x128xf32>
    %39 = math.tanh %38 : vector<1x128xf32>
    %cst_16 = arith.constant 2.000000e+00 : f32
    %40 = vector.broadcast %cst_16 : f32 to vector<1x128xf32>
    %41 = arith.mulf %39, %40 : vector<1x128xf32>
    %c0_17 = arith.constant 0 : index
    %c0_18 = arith.constant 0 : index
    %42 = vector.load %arg8[%c0_17, %c0_18] : memref<1x128xf32, #tpu.memory_space<vmem>>, vector<1x128xf32>
    tpu.vector_store %arg8[%c0_17, %c0_18], %41 {strides = array<i32>} : memref<1x128xf32, #tpu.memory_space<vmem>>, vector<1x128xf32>,
    return
  }
  func.func @transform_0(%arg0: i32) -> (i32, i32) {
    %c0_i32 = arith.constant 0 : i32
    %c0_i32_0 = arith.constant 0 : i32
    return %c0_i32, %arg0 : i32, i32
  }
  func.func @transform_1(%arg0: i32) -> (i32, i32) {
    %c0_i32 = arith.constant 0 : i32
    %c0_i32_0 = arith.constant 0 : i32
    %c0_i32_1 = arith.constant 0 : i32
    return %c0_i32, %c0_i32_0 : i32, i32
  }
  func.func @transform_2(%arg0: i32) -> (i32, i32) {
    %c0_i32 = arith.constant 0 : i32
    %c0_i32_0 = arith.constant 0 : i32
    %c0_i32_1 = arith.constant 0 : i32
    return %c0_i32, %c0_i32_0 : i32, i32
  }
  func.func @transform_3(%arg0: i32) -> (i32, i32) {
    %c0_i32 = arith.constant 0 : i32
    %c0_i32_0 = arith.constant 0 : i32
    %c0_i32_1 = arith.constant 0 : i32
    return %c0_i32, %c0_i32_0 : i32, i32
  }
  func.func @transform_4(%arg0: i32) -> (i32, i32) {
    %c0_i32 = arith.constant 0 : i32
    %c0_i32_0 = arith.constant 0 : i32
    %c0_i32_1 = arith.constant 0 : i32
    return %c0_i32, %c0_i32_0 : i32, i32
  }
  func.func @transform_5(%arg0: i32) -> (i32, i32) {
    %c0_i32 = arith.constant 0 : i32
    %c0_i32_0 = arith.constant 0 : i32
    %c0_i32_1 = arith.constant 0 : i32
    return %c0_i32, %c0_i32_0 : i32, i32
  }
  func.func @transform_6(%arg0: i32) -> (i32, i32) {
    %c0_i32 = arith.constant 0 : i32
    %c0_i32_0 = arith.constant 0 : i32
    %c0_i32_1 = arith.constant 0 : i32
    return %c0_i32, %c0_i32_0 : i32, i32
  }
  func.func @transform_7(%arg0: i32) -> (i32, i32) {
    %c0_i32 = arith.constant 0 : i32
    %c0_i32_0 = arith.constant 0 : i32
    return %c0_i32, %arg0 : i32, i32
  }
}

</mosaic_0001>

<bundles_post_ra>
// kernel: tpu_custom_call.1
= control target key start
LH: loop header
LB: loop body
LE: loop exit
PB: predicated region body
PF: predicated region fallthrough
CT: control target
= control target key end

     0   :  { %v904_v1 = vmov 2   ;;  %v905_v2 = vmov 1   ;;  %s1265_s0 = inlined_call_operand.vmem [shape: f32[3,128], index: 0, kind: input, shape index: {}]   ;;  %s1266_s1 = inlined_call_operand.vmem [shape: f32[128,3], index: 1, kind: input, shape index: {}]   ;;  %s1267_s2 = inlined_call_operand.vmem [shape: f32[128,1], index: 2, kind: input, shape index: {}]   ;;  %s1268_s3 = inlined_call_operand.vmem [shape: f32[64,128], index: 3, kind: input, shape index: {}]   ;;  %s1269_s4 = inlined_call_operand.vmem [shape: f32[64,1], index: 4, kind: input, shape index: {}]   ;;  %s1270_s5 = inlined_call_operand.vmem [shape: f32[64,1], index: 5, kind: input, shape index: {}]   ;;  %s1271_s6 = inlined_call_operand.<no memory space> [shape: f32[1,1], index: 6, kind: input, shape index: {}]   ;;  %s1272_s7 = inlined_call_operand.hbm [shape: f32[1,128], index: 7, kind: output, shape index: {}]  }
   0x1   :  { %v29_v0 = vld [vmem:[%s1266_s1] sm:$0xff]  ;;  %852 = vset.pattern.permute.xlu0 %v904_v1  ;;  %851 = vset.pattern.permute.xlu1 %v905_v2  ;;  %v31_v3 = vld [vmem:[%s1266_s1 + $0x10] sm:$0xff]  ;;  %v30_v4 = vld [vmem:[%s1266_s1 + $0x8] sm:$0xff] }
   0x2   :  { %246 = vperm.xlu0 %852, %v29_v0   ;;  %146 = vperm.xlu1 %851, %v29_v0   ;;  %v34_v5 = vld [vmem:[%s1266_s1 + $0x28] sm:$0xff]  ;;  %v33_v6 = vld [vmem:[%s1266_s1 + $0x20] sm:$0xff] }
   0x6   :  { %254 = vperm.xlu0 %852, %v31_v3   ;;  %150 = vperm.xlu1 %851, %v30_v4  }
   0xa   :  { %266 = vperm.xlu0 %852, %v34_v5   ;;  %853 = vset.pattern.permute.xlu1 %v904_v1 }
   0xb   :  { %250 = vperm.xlu1 %853, %v30_v4  }
   0xc   :  { %13 = vsyncpa [#allocation4], 0  ;;  %v906_v7 = vmov 0   ;;  %v36_v8 = vld [vmem:[%s1266_s1 + $0x38] sm:$0xff]  ;;  %v975_v9 = vld [vmem:[%s1266_s1 + $0x48] sm:$0xff]  ;;  %v125_v51 = vlaneseq  ;;  %s907_s16 = smov [#allocation3]  }
   0xd   :  { %v32_v10 = vld [vmem:[%s1266_s1 + $0x18] sm:$0xff]  ;;  %v990_v12 = vld [vmem:[%s1266_s1 + $0x68] sm:$0xff]  ;;  %v345_v14 = vld [vmem:[%s1267_s2] sm:$0xff]  ;;  %s723_s17 = sshll.u32 %s907_s16, 4  ;;  %s724_s17 = int_to_ptr.vmem [resolvable:$true] %s723_s17 }
   0xe   :  { %860 = vset.pattern.permute.xlu0 %v905_v2  ;;  %v984_v11 = vld [vmem:[%s1266_s1 + $0x58] sm:$0xff]  ;;  %v346_v15 = vld [vmem:[%s1267_s2 + $0x8] sm:$0xff]  ;;  %v35_v16 = vld [vmem:[%s1266_s1 + $0x30] sm:$0xff]  ;;  %v126_v55 = vshrl.u32 %v125_v51, 7  ;;  %s880_s18 = scalar_lea.vmem %s724_s17, 16  ;;  %s884_s19 = scalar_lea.vmem %s724_s17, 32 }
   0xf   :  { %162 = vperm.xlu0 %860, %v33_v6   ;;  %854 = vset.pattern.permute.xlu1 %v906_v7  ;;  %v997_v13 = vld [vmem:[%s1266_s1 + $0x78] sm:$0xff]  ;;  %v347_v17 = vld [vmem:[%s1267_s2 + $0x10] sm:$0xff]  ;;  %v349_v18 = vld [vmem:[%s1267_s2 + $0x20] sm:$0xff]  ;;  %p881_p0 = scmp.ne.s32.totalorder %s724_s17, %s880_s18  ;;  %p885_p1 = scmp.lt.s32.totalorder %s724_s17, %s724_s17 }
  0x10   :  { %57 = vperm.xlu1 %854, %v31_v3   ;;  %v348_v19 = vld [vmem:[%s1267_s2 + $0x18] sm:$0xff]  ;;  %v351_v20 = vld [vmem:[%s1267_s2 + $0x30] sm:$0xff]  ;;  %v353_v21 = vld [vmem:[%s1267_s2 + $0x40] sm:$0xff]  ;;  %v211_v58 = vsub.s32 1, %v126_v55  ;;  %v127_v60 = vsub.s32 0, %v126_v55  ;;  %p886_p2 = scmp.lt.s32.totalorder %s884_s19, %s880_s18 }
  0x11   :  { %v355_v22 = vld [vmem:[%s1267_s2 + $0x50] sm:$0xff]  ;;  %v350_v23 = vld [vmem:[%s1267_s2 + $0x28] sm:$0xff]  ;;  %v37_v24 = vld [vmem:[%s1266_s1 + $0x40] sm:$0xff] }
  0x12   :  { %v357_v25 = vld [vmem:[%s1267_s2 + $0x60] sm:$0xff]  ;;  %v360_v26 = vld [vmem:[%s1267_s2 + $0x78] sm:$0xff]  ;;  %v482_v27 = vld [vmem:[%s1269_s4 + $0x8] sm:$0xff]  ;;  %p887_p3 = por %p886_p2, %p885_p1 }
  0x13   :  { %174 = vperm.xlu0 %860, %v36_v8   ;;  %v484_v28 = vld [vmem:[%s1269_s4 + $0x18] sm:$0xff]  ;;  %v643_v29 = vld [vmem:[%s1270_s5 + $0x8] sm:$0xff]  ;;  %v644_v31 = vld [vmem:[%s1270_s5 + $0x10] sm:$0xff] }
  0x14   :  { %855 = vset.pattern.permute.xlu1 %v905_v2  ;;  %v352_v30 = vld [vmem:[%s1267_s2 + $0x38] sm:$0xff]  ;;  %v39_v32 = vld [vmem:[%s1266_s1 + $0x50] sm:$0xff]  ;;  %v646_v34 = vld [vmem:[%s1270_s5 + $0x20] sm:$0xff]  ;;  %p888_p4 = pnand %p887_p3, %p881_p0 }
  0x15   :  { %154 = vperm.xlu1 %855, %v31_v3   ;;  %v645_v33 = vld [vmem:[%s1270_s5 + $0x18] sm:$0xff]  ;;  %v647_v35 = vld [vmem:[%s1270_s5 + $0x28] sm:$0xff]  ;;  %v41_v40 = vld [vmem:[%s1266_s1 + $0x60] sm:$0xff] }
  0x16   :  { %v649_v36 = vld [vmem:[%s1270_s5 + $0x38] sm:$0xff]  ;;  %v354_v37 = vld [vmem:[%s1267_s2 + $0x48] sm:$0xff]  ;;  %v43_v54 = vld [vmem:[%s1266_s1 + $0x70] sm:$0xff] }
  0x17   :  { %182 = vperm.xlu0 %860, %v975_v9   ;;  %v356_v50 = vld [vmem:[%s1267_s2 + $0x58] sm:$0xff]  ;;  %v28_v59 = vld [vmem:[%s1265_s0] sm:$0x7] }
  0x18   :  { %v1125_v63 = vrot.slane %v28_v59, %v211_v58  ;;  %v1127_v3 = vrot.slane %v28_v59, %v127_v60 }
  0x19   :  { %158 = vperm.xlu1 %855, %v32_v10  }
  0x1b   :  { %190 = vperm.xlu0 %860, %v984_v11  }
  0x1d   :  { %856 = vset.pattern.permute.xlu1 %v904_v1 }
  0x1e   :  { %258 = vperm.xlu1 %856, %v32_v10  }
  0x1f   :  { %198 = vperm.xlu0 %860, %v990_v12  }
  0x22   :  { %857 = vset.pattern.permute.xlu1 %v906_v7 }
  0x23   :  { %206 = vperm.xlu0 %860, %v997_v13   ;;  %363 = vperm.xlu1 %857, %v345_v14  }
  0x27   :  { %875 = vset.pattern.permute.xlu0 %v906_v7  ;;  %67 = vperm.xlu1 %857, %v33_v6  }
  0x28   :  { %47 = vperm.xlu0 %875, %v29_v0   ;;  %v311_v0 = vsub.s32 2, %v126_v55 }
  0x2b   :  { %72 = vperm.xlu1 %857, %v34_v5  }
  0x2c   :  { %52 = vperm.xlu0 %875, %v30_v4  }
  0x2f   :  { %858 = vset.pattern.permute.xlu1 %v905_v2 }
  0x30   :  { %62 = vperm.xlu0 %875, %v32_v10   ;;  %166 = vperm.xlu1 %858, %v34_v5  }
  0x34   :  { %368 = vperm.xlu0 %875, %v346_v15   ;;  %859 = vset.pattern.permute.xlu1 %v904_v1 }
  0x35   :  { %262 = vperm.xlu1 %859, %v33_v6  }
  0x38   :  { %77 = vperm.xlu0 %875, %v35_v16  }
  0x39   :  { %861 = vset.pattern.permute.xlu1 %v906_v7 }
  0x3a   :  { %373 = vperm.xlu1 %861, %v347_v17   ;;  %v358_v17 = vld [vmem:[%s1267_s2 + $0x68] sm:$0xff] }
  0x3c   :  { %383 = vperm.xlu0 %875, %v349_v18  }
  0x3e   :  { %378 = vperm.xlu1 %861, %v348_v19  }
  0x40   :  { %92 = vperm.xlu0 %875, %v975_v9  }
  0x42   :  { %82 = vperm.xlu1 %861, %v36_v8  }
  0x44   :  { %393 = vperm.xlu0 %875, %v351_v20  }
  0x46   :  { %862 = vset.pattern.permute.xlu1 %v905_v2 }
  0x47   :  { %170 = vperm.xlu1 %862, %v35_v16  }
  0x48   :  { %102 = vperm.xlu0 %875, %v984_v11  }
  0x4b   :  { %863 = vset.pattern.permute.xlu1 %v904_v1 }
  0x4c   :  { %403 = vperm.xlu0 %875, %v353_v21   ;;  %270 = vperm.xlu1 %863, %v35_v16  }
  0x50   :  { %112 = vperm.xlu0 %875, %v990_v12   ;;  %274 = vperm.xlu1 %863, %v36_v8   ;;  %v1133_v8 = vrot.slane %v28_v59, %v311_v0  ;;  %v486_v59 = vld [vmem:[%s1269_s4 + $0x28] sm:$0xff] }
  0x54   :  { %413 = vperm.xlu0 %875, %v355_v22   ;;  %864 = vset.pattern.permute.xlu1 %v906_v7 }
  0x55   :  { %388 = vperm.xlu1 %864, %v350_v23  }
  0x58   :  { %122 = vperm.xlu0 %875, %v997_v13  }
  0x59   :  { %87 = vperm.xlu1 %864, %v37_v24  }
  0x5c   :  { %423 = vperm.xlu0 %875, %v357_v25  }
  0x5d   :  { %865 = vset.pattern.permute.xlu1 %v905_v2 }
  0x5e   :  { %178 = vperm.xlu1 %865, %v37_v24  }
  0x60   :  { %438 = vperm.xlu0 %875, %v360_v26  }
  0x62   :  { %866 = vset.pattern.permute.xlu1 %v904_v1 }
  0x63   :  { %278 = vperm.xlu1 %866, %v37_v24  }
  0x64   :  { %496 = vperm.xlu0 %875, %v482_v27  }
  0x67   :  { %282 = vperm.xlu1 %866, %v975_v9  }
  0x68   :  { %506 = vperm.xlu0 %875, %v484_v28  }
  0x6b   :  { %867 = vset.pattern.permute.xlu1 %v906_v7 }
  0x6c   :  { %657 = vperm.xlu0 %875, %v643_v29   ;;  %398 = vperm.xlu1 %867, %v352_v30  }
  0x70   :  { %662 = vperm.xlu0 %875, %v644_v31   ;;  %97 = vperm.xlu1 %867, %v39_v32  }
  0x74   :  { %667 = vperm.xlu0 %875, %v645_v33   ;;  %868 = vset.pattern.permute.xlu1 %v905_v2  ;;  %v481_v33 = vld [vmem:[%s1269_s4] sm:$0xff] }
  0x75   :  { %186 = vperm.xlu1 %868, %v39_v32  }
  0x78   :  { %672 = vperm.xlu0 %875, %v646_v34  }
  0x79   :  { %869 = vset.pattern.permute.xlu1 %v904_v1 }
  0x7a   :  { %286 = vperm.xlu1 %869, %v39_v32  }
  0x7c   :  { %677 = vperm.xlu0 %875, %v647_v35  }
  0x7e   :  { %290 = vperm.xlu1 %869, %v984_v11  }
  0x80   :  { %687 = vperm.xlu0 %875, %v649_v36  }
  0x81   :  { %v147_v38 = vpop.permute.xlu1 %146  ;;  %v247_v39 = vpop.permute.xlu0 %246 }
  0x82   :  { %870 = vset.pattern.permute.xlu1 %v906_v7  ;;  %v213_v6 = vmul.f32 %v1125_v63, %v147_v38  ;;  %v313_v9 = vmul.f32 %v1133_v8, %v247_v39  ;;  %v483_v39 = vld [vmem:[%s1269_s4 + $0x10] sm:$0xff] }
  0x83   :  { %408 = vperm.xlu1 %870, %v354_v37  }
  0x85   :  { %v151_v41 = vpop.permute.xlu1 %150  ;;  %v1095_v42 = vpop.permute.xlu0 %254 }
  0x86   :  { %v214_v14 = vmul.f32 %v1125_v63, %v151_v41  ;;  %v315_v29 = vmul.f32 %v1133_v8, %v1095_v42  ;;  %v473_v42 = vld [vmem:[%s1268_s3] sm:$0xff] }
  0x87   :  { %107 = vperm.xlu1 %870, %v41_v40   ;;  %787 = vmatprep.mubr.f32.mxu0 %v473_v42 }
  0x89   :  { %v1097_v43 = vpop.permute.xlu0 %266 }
  0x8a   :  { %v251_v44 = vpop.permute.xlu1 %250 }
  0x8b   :  { %871 = vset.pattern.permute.xlu1 %v905_v2  ;;  %v314_v20 = vmul.f32 %v1133_v8, %v251_v44  ;;  %v477_v44 = vld [vmem:[%s1268_s3 + $0x20] sm:$0xff] }
  0x8c   :  { %194 = vperm.xlu1 %871, %v41_v40   ;;  %793 = vmatprep.mubr.f32.mxu1 %v477_v44 }
  0x8e   :  { %v1100_v45 = vpop.permute.xlu0 %162 }
  0x8f   :  { %v58_v46 = vpop.permute.xlu1 %57  ;;  %v217_v0 = vmul.f32 %v1125_v63, %v1100_v45 }
  0x90   :  { %872 = vset.pattern.permute.xlu1 %v904_v1  ;;  %v131_v25 = vmul.f32 %v1127_v3, %v58_v46 }
  0x91   :  { %294 = vperm.xlu1 %872, %v41_v40  }
  0x92   :  { %v1103_v47 = vpop.permute.xlu0 %174 }
  0x94   :  { %v155_v48 = vpop.permute.xlu1 %154 }
  0x95   :  { %298 = vperm.xlu1 %872, %v990_v12   ;;  %v215_v21 = vmul.f32 %v1125_v63, %v155_v48 }
  0x96   :  { %v1106_v49 = vpop.permute.xlu0 %182 }
  0x98   :  { %v159_v52 = vpop.permute.xlu1 %158 }
  0x99   :  { %873 = vset.pattern.permute.xlu1 %v906_v7  ;;  %v216_v30 = vmul.f32 %v1125_v63, %v159_v52 }
  0x9a   :  { %418 = vperm.xlu1 %873, %v356_v50   ;;  %v1112_v53 = vpop.permute.xlu0 %190  ;;  %v642_v50 = vld [vmem:[%s1270_s5] sm:$0xff] }
  0x9d   :  { %v259_v56 = vpop.permute.xlu1 %258 }
  0x9e   :  { %117 = vperm.xlu1 %873, %v43_v54   ;;  %v1117_v57 = vpop.permute.xlu0 %198  ;;  %v316_v37 = vmul.f32 %v1133_v8, %v259_v56  ;;  %v485_v56 = vld [vmem:[%s1269_s4 + $0x20] sm:$0xff] }
  0xa2   :  { %874 = vset.pattern.permute.xlu1 %v905_v2  ;;  %v364_v61 = vpop.permute.xlu1 %363  ;;  %v1123_v62 = vpop.permute.xlu0 %206 }
  0xa3   :  { %202 = vperm.xlu1 %874, %v43_v54  }
  0xa6   :  { %v1129_v4 = vpop.permute.xlu1 %67 }
  0xa7   :  { %v48_v5 = vpop.permute.xlu0 %47  ;;  %876 = vset.pattern.permute.xlu1 %v904_v1 }
  0xa8   :  { %v129_v2 = vmul.f32 %v1127_v3, %v48_v5  ;;  %302 = vperm.xlu1 %876, %v43_v54   ;;  %v133_v5 = vmul.f32 %v1127_v3, %v1129_v4 }
  0xaa   :  { %v229_v10 = vadd.f32 %v213_v6, %v129_v2  ;;  %v1137_v11 = vpop.permute.xlu1 %72  ;;  %v233_v45 = vadd.f32 %v217_v0, %v133_v5 }
  0xab   :  { %v53_v12 = vpop.permute.xlu0 %52 }
  0xac   :  { %v130_v15 = vmul.f32 %v1127_v3, %v53_v12  ;;  %306 = vperm.xlu1 %876, %v997_v13   ;;  %v329_v1 = vadd.f32 %v313_v9, %v229_v10  ;;  %v359_v13 = vld [vmem:[%s1267_s2 + $0x70] sm:$0xff]  ;;  %v134_v9 = vmul.f32 %v1127_v3, %v1137_v11  ;;  %v488_v12 = vld [vmem:[%s1269_s4 + $0x38] sm:$0xff] }
  0xad   :  { %v648_v11 = vld [vmem:[%s1270_s5 + $0x30] sm:$0xff] }
  0xae   :  { %v230_v16 = vadd.f32 %v214_v14, %v130_v15  ;;  %v441_v23 = vadd.f32 %v364_v61, %v329_v1  ;;  %v487_v61 = vld [vmem:[%s1269_s4 + $0x30] sm:$0xff]  ;;  %v318_v14 = vmul.f32 %v1133_v8, %v1097_v43 }
  0xaf   :  { %v63_v18 = vpop.permute.xlu0 %62  ;;  %v167_v19 = vpop.permute.xlu1 %166 }
  0xb0   :  { %877 = vset.pattern.permute.xlu1 %v906_v7  ;;  %v330_v22 = vadd.f32 %v314_v20, %v230_v16  ;;  %v132_v26 = vmul.f32 %v1127_v3, %v63_v18  ;;  %v231_v7 = vadd.f32 %v215_v21, %v131_v25  ;;  %v457_v31 = vmax.f32 %v441_v23, 0.0 }
  0xb1   :  { %428 = vperm.xlu1 %877, %v358_v17   ;;  %v218_v6 = vmul.f32 %v1125_v63, %v167_v19 }
  0xb2   :  { %v232_v34 = vadd.f32 %v216_v30, %v132_v26  ;;  %v331_v38 = vadd.f32 %v315_v29, %v231_v7  ;;  %v220_v29 = vmul.f32 %v1125_v63, %v1103_v47 }
  0xb3   :  { %v369_v24 = vpop.permute.xlu0 %368  ;;  %v234_v15 = vadd.f32 %v218_v6, %v134_v9 }
  0xb4   :  { %v442_v27 = vadd.f32 %v369_v24, %v330_v22  ;;  %v263_v28 = vpop.permute.xlu1 %262  ;;  %v332_v41 = vadd.f32 %v316_v37, %v232_v34 }
  0xb5   :  { %433 = vperm.xlu1 %877, %v359_v13   ;;  %v317_v10 = vmul.f32 %v1133_v8, %v263_v28  ;;  %v334_v18 = vadd.f32 %v318_v14, %v234_v15 }
  0xb6   :  { %v458_v32 = vmax.f32 %v442_v27, 0.0 }
  0xb7   :  { %v78_v60 = vpop.permute.xlu0 %77  ;;  %v333_v16 = vadd.f32 %v317_v10, %v233_v45 }
  0xb8   :  { %v799_v35 = vpack.c.bf16 %v458_v32, %v457_v31  ;;  %v135_v24 = vmul.f32 %v1127_v3, %v78_v60 }
  0xb9   :  { %491 = vperm.xlu1 %877, %v481_v33   ;;  %v374_v36 = vpop.permute.xlu1 %373 }
  0xba   :  { %800 = vmatprep.subr.bf16.mxu0 %v799_v35  ;;  %831 = vmatprep.subr.bf16.mxu1 %v799_v35  ;;  %v443_v40 = vadd.f32 %v374_v36, %v331_v38 }
  0xbb   :  { %802 = vmatpush3.bf16.msra.mxu0 %v799_v35  ;;  %839 = vmatpush3.bf16.msra.mxu1 %v799_v35  ;;  %v384_v4 = vpop.permute.xlu0 %383 }
  0xbc   :  { %v459_v51 = vmax.f32 %v443_v40, 0.0  ;;  %v445_v17 = vadd.f32 %v384_v4, %v333_v16 }
  0xbd   :  { %501 = vperm.xlu1 %877, %v483_v39   ;;  %v379_v46 = vpop.permute.xlu1 %378 }
  0xbe   :  { %v444_v48 = vadd.f32 %v379_v46, %v332_v41  ;;  %v461_v21 = vmax.f32 %v445_v17, 0.0  ;;  %v224_v17 = vmul.f32 %v1125_v63, %v1112_v53 }
  0xbf   :  { %v93_v28 = vpop.permute.xlu0 %92 }
  0xc0   :  { %v460_v52 = vmax.f32 %v444_v48, 0.0  ;;  %v222_v48 = vmul.f32 %v1125_v63, %v1106_v49 }
  0xc1   :  { %652 = vperm.xlu1 %877, %v642_v50   ;;  %v83_v54 = vpop.permute.xlu1 %82  ;;  %v138_v50 = vmul.f32 %v1127_v3, %v93_v28 }
  0xc2   :  { %v803_v55 = vpack.c.bf16 %v460_v52, %v459_v51  ;;  %v136_v7 = vmul.f32 %v1127_v3, %v83_v54 }
  0xc3   :  { %v394_v35 = vpop.permute.xlu0 %393 }
  0xc4   :  { %804 = vmatprep.subr.bf16.mxu0 %v803_v55  ;;  %832 = vmatprep.subr.bf16.mxu1 %v803_v55  ;;  %v236_v34 = vadd.f32 %v220_v29, %v136_v7 }
  0xc5   :  { %511 = vperm.xlu1 %877, %v485_v56   ;;  %806 = vmatpush3.bf16.msra.mxu0 %v803_v55 }
  0xc6   :  { %840 = vmatpush3.bf16.msra.mxu1 %v803_v55  ;;  %v171_v58 = vpop.permute.xlu1 %170 }
  0xc7   :  { %v219_v25 = vmul.f32 %v1125_v63, %v171_v58  ;;  %v103_v55 = vpop.permute.xlu0 %102  ;;  %v238_v58 = vadd.f32 %v222_v48, %v138_v50 }
  0xc9   :  { %516 = vperm.xlu1 %877, %v486_v59   ;;  %v235_v30 = vadd.f32 %v219_v25, %v135_v24 }
  0xcb   :  { %v271_v2 = vpop.permute.xlu1 %270  ;;  %v404_v0 = vpop.permute.xlu0 %403 }
  0xcc   :  { %v319_v26 = vmul.f32 %v1133_v8, %v271_v2 }
  0xcd   :  { %521 = vperm.xlu1 %877, %v487_v61  }
  0xce   :  { %v335_v31 = vadd.f32 %v319_v26, %v235_v30 }
  0xcf   :  { %v275_v1 = vpop.permute.xlu1 %274 }
  0xd0   :  { %v320_v32 = vmul.f32 %v1133_v8, %v275_v1  ;;  %v447_v36 = vadd.f32 %v394_v35, %v335_v31 }
  0xd1   :  { %526 = vperm.xlu1 %877, %v488_v12  }
  0xd2   :  { %v336_v37 = vadd.f32 %v320_v32, %v236_v34  ;;  %v463_v40 = vmax.f32 %v447_v36, 0.0  ;;  %v226_v36 = vmul.f32 %v1125_v63, %v1117_v57 }
  0xd4   :  { %v389_v19 = vpop.permute.xlu1 %388 }
  0xd5   :  { %v446_v20 = vadd.f32 %v389_v19, %v334_v18  ;;  %682 = vperm.xlu1 %877, %v648_v11   ;;  %v113_v11 = vpop.permute.xlu0 %112  ;;  %v140_v18 = vmul.f32 %v1127_v3, %v103_v55 }
  0xd7   :  { %v462_v22 = vmax.f32 %v446_v20, 0.0 }
  0xd8   :  { %v88_v23 = vpop.permute.xlu1 %87 }
  0xd9   :  { %v807_v13 = vpack.c.bf16 %v462_v22, %v461_v21  ;;  %v137_v51 = vmul.f32 %v1127_v3, %v88_v23  ;;  %v240_v23 = vadd.f32 %v224_v17, %v140_v18 }
  0xdb   :  { %808 = vmatprep.subr.bf16.mxu0 %v807_v13  ;;  %833 = vmatprep.subr.bf16.mxu1 %v807_v13 }
  0xdc   :  { %810 = vmatpush3.bf16.msra.mxu0 %v807_v13  ;;  %841 = vmatpush3.bf16.msra.mxu1 %v807_v13  ;;  %v414_v13 = vpop.permute.xlu0 %413 }
  0xdd   :  { %v179_v43 = vpop.permute.xlu1 %178 }
  0xde   :  { %v221_v46 = vmul.f32 %v1125_v63, %v179_v43 }
  0xe0   :  { %v237_v56 = vadd.f32 %v221_v46, %v137_v51  ;;  %v123_v31 = vpop.permute.xlu0 %122 }
  0xe2   :  { %v279_v27 = vpop.permute.xlu1 %278 }
  0xe3   :  { %v321_v52 = vmul.f32 %v1133_v8, %v279_v27 }
  0xe5   :  { %v337_v59 = vadd.f32 %v321_v52, %v237_v56 }
  0xe6   :  { %v283_v33 = vpop.permute.xlu1 %282 }
  0xe7   :  { %v322_v60 = vmul.f32 %v1133_v8, %v283_v33  ;;  %v449_v5 = vadd.f32 %v404_v0, %v337_v59 }
  0xe9   :  { %v338_v6 = vadd.f32 %v322_v60, %v238_v58  ;;  %v465_v49 = vmax.f32 %v449_v5, 0.0 }
  0xeb   :  { %v399_v38 = vpop.permute.xlu1 %398 }
  0xec   :  { %v448_v39 = vadd.f32 %v399_v38, %v336_v37  ;;  %v228_v37 = vmul.f32 %v1125_v63, %v1123_v62  ;;  %v142_v38 = vmul.f32 %v1127_v3, %v113_v11 }
  0xee   :  { %v464_v41 = vmax.f32 %v448_v39, 0.0  ;;  %v144_v39 = vmul.f32 %v1127_v3, %v123_v31  ;;  %v242_v46 = vadd.f32 %v226_v36, %v142_v38 }
  0xef   :  { %v98_v42 = vpop.permute.xlu1 %97 }
  0xf0   :  { %v811_v44 = vpack.c.bf16 %v464_v41, %v463_v40  ;;  %v139_v1 = vmul.f32 %v1127_v3, %v98_v42  ;;  %v244_v48 = vadd.f32 %v228_v37, %v144_v39 }
  0xf2   :  { %812 = vmatprep.subr.bf16.mxu0 %v811_v44  ;;  %834 = vmatprep.subr.bf16.mxu1 %v811_v44 }
  0xf3   :  { %814 = vmatpush3.bf16.msra.mxu0 %v811_v44  ;;  %842 = vmatpush3.bf16.msra.mxu1 %v811_v44  ;;  %v424_v44 = vpop.permute.xlu0 %423 }
  0xf4   :  { %v187_v47 = vpop.permute.xlu1 %186 }
  0xf5   :  { %v223_v15 = vmul.f32 %v1125_v63, %v187_v47 }
  0xf7   :  { %v239_v19 = vadd.f32 %v223_v15, %v139_v1  ;;  %v439_v59 = vpop.permute.xlu0 %438  ;;  %v480_v15 = vld [vmem:[%s1268_s3 + $0x38] sm:$0xff] }
  0xf9   :  { %v287_v54 = vpop.permute.xlu1 %286 }
  0xfa   :  { %v323_v4 = vmul.f32 %v1133_v8, %v287_v54 }
  0xfc   :  { %v339_v20 = vadd.f32 %v323_v4, %v239_v19  ;;  %v497_v4 = vpop.permute.xlu0 %496 }
  0xfd   :  { %v291_v61 = vpop.permute.xlu1 %290 }
  0xfe   :  { %v324_v21 = vmul.f32 %v1133_v8, %v291_v61  ;;  %v451_v43 = vadd.f32 %v414_v13, %v339_v20 }
 0x100   :  { %v340_v24 = vadd.f32 %v324_v21, %v240_v23  ;;  %v467_v27 = vmax.f32 %v451_v43, 0.0  ;;  %v507_v11 = vpop.permute.xlu0 %506 }
 0x102   :  { %v409_v2 = vpop.permute.xlu1 %408 }
 0x103   :  { %v450_v9 = vadd.f32 %v409_v2, %v338_v6 }
 0x104   :  { %v658_v18 = vpop.permute.xlu0 %657 }
 0x105   :  { %v466_v10 = vmax.f32 %v450_v9, 0.0 }
 0x106   :  { %v108_v12 = vpop.permute.xlu1 %107 }
 0x107   :  { %v815_v14 = vpack.c.bf16 %v466_v10, %v465_v49  ;;  %v141_v32 = vmul.f32 %v1127_v3, %v108_v12  ;;  %v478_v10 = vld [vmem:[%s1268_s3 + $0x28] sm:$0xff]  ;;  %v475_v12 = vld [vmem:[%s1268_s3 + $0x10] sm:$0xff] }
 0x108   :  { %v663_v20 = vpop.permute.xlu0 %662 }
 0x109   :  { %816 = vmatprep.subr.bf16.mxu0 %v815_v14  ;;  %835 = vmatprep.subr.bf16.mxu1 %v815_v14 }
 0x10a   :  { %818 = vmatpush3.bf16.msra.mxu0 %v815_v14  ;;  %843 = vmatpush3.bf16.msra.mxu1 %v815_v14  ;;  %v479_v14 = vld [vmem:[%s1268_s3 + $0x30] sm:$0xff] }
 0x10b   :  { %v195_v45 = vpop.permute.xlu1 %194 }
 0x10c   :  { %v225_v30 = vmul.f32 %v1125_v63, %v195_v45  ;;  %v476_v45 = vld [vmem:[%s1268_s3 + $0x18] sm:$0xff] }
 0x10e   :  { %v241_v35 = vadd.f32 %v225_v30, %v141_v32 }
 0x110   :  { %v295_v16 = vpop.permute.xlu1 %294 }
 0x111   :  { %v325_v33 = vmul.f32 %v1133_v8, %v295_v16 }
 0x113   :  { %v341_v40 = vadd.f32 %v325_v33, %v241_v35 }
 0x114   :  { %v299_v22 = vpop.permute.xlu1 %298 }
 0x115   :  { %v326_v41 = vmul.f32 %v1133_v8, %v299_v22  ;;  %v453_v51 = vadd.f32 %v424_v44, %v341_v40  ;;  %v668_v22 = vpop.permute.xlu0 %667 }
 0x117   :  { %v342_v54 = vadd.f32 %v326_v41, %v242_v46  ;;  %v469_v61 = vmax.f32 %v453_v51, 0.0 }
 0x119   :  { %v419_v25 = vpop.permute.xlu1 %418  ;;  %v673_v37 = vpop.permute.xlu0 %672 }
 0x11a   :  { %v452_v26 = vadd.f32 %v419_v25, %v340_v24 }
 0x11c   :  { %v468_v28 = vmax.f32 %v452_v26, 0.0 }
 0x11d   :  { %v118_v29 = vpop.permute.xlu1 %117 }
 0x11e   :  { %v819_v7 = vpack.c.bf16 %v468_v28, %v467_v27  ;;  %v143_v57 = vmul.f32 %v1127_v3, %v118_v29 }
 0x120   :  { %820 = vmatprep.subr.bf16.mxu0 %v819_v7  ;;  %836 = vmatprep.subr.bf16.mxu1 %v819_v7 }
 0x121   :  { %822 = vmatpush3.bf16.msra.mxu0 %v819_v7  ;;  %844 = vmatpush3.bf16.msra.mxu1 %v819_v7 }
 0x122   :  { %v203_v53 = vpop.permute.xlu1 %202 }
 0x123   :  { %v227_v50 = vmul.f32 %v1125_v63, %v203_v53 }
 0x125   :  { %v243_v56 = vadd.f32 %v227_v50, %v143_v57 }
 0x127   :  { %v303_v34 = vpop.permute.xlu1 %302 }
 0x128   :  { %v327_v62 = vmul.f32 %v1133_v8, %v303_v34 }
 0x12a   :  { %v343_v5 = vadd.f32 %v327_v62, %v243_v56  ;;  %v678_v62 = vpop.permute.xlu0 %677 }
 0x12b   :  { %v307_v42 = vpop.permute.xlu1 %306 }
 0x12c   :  { %v328_v47 = vmul.f32 %v1133_v8, %v307_v42  ;;  %v474_v8 = vld [vmem:[%s1268_s3 + $0x8] sm:$0xff] }
 0x12e   :  { %v344_v52 = vadd.f32 %v328_v47, %v244_v48 }
 0x130   :  { %v429_v55 = vpop.permute.xlu1 %428  ;;  %v456_v60 = vadd.f32 %v439_v59, %v344_v52 }
 0x131   :  { %v454_v58 = vadd.f32 %v429_v55, %v342_v54 }
 0x132   :  { %v472_v63 = vmax.f32 %v456_v60, 0.0 }
 0x133   :  { %v470_v0 = vmax.f32 %v454_v58, 0.0 }
 0x134   :  { %v434_v6 = vpop.permute.xlu1 %433 }
 0x135   :  { %v823_v2 = vpack.c.bf16 %v470_v0, %v469_v61  ;;  %v455_v9 = vadd.f32 %v434_v6, %v343_v5  ;;  %v688_v5 = vpop.permute.xlu0 %687 }
 0x137   :  { %v471_v49 = vmax.f32 %v455_v9, 0.0  ;;  %824 = vmatprep.subr.bf16.mxu0 %v823_v2  ;;  %837 = vmatprep.subr.bf16.mxu1 %v823_v2 }
 0x138   :  { %826 = vmatpush3.bf16.msra.mxu0 %v823_v2  ;;  %845 = vmatpush3.bf16.msra.mxu1 %v823_v2  ;;  %v492_v1 = vpop.permute.xlu1 %491 }
 0x139   :  { %v827_v3 = vpack.c.bf16 %v472_v63, %v471_v49 }
 0x13b   :  { %828 = vmatprep.subr.bf16.mxu0 %v827_v3  ;;  %838 = vmatprep.subr.bf16.mxu1 %v827_v3 }
 0x13c   :  { %830 = vmatpush3.bf16.msra.mxu0 %v827_v3  ;;  %846 = vmatpush3.bf16.msra.mxu1 %v827_v3  ;;  %v502_v16 = vpop.permute.xlu1 %501 }
 0x13f   :  { %788 = vmatmul.mubr.f32.vlgmr.msra.gmra.mrb[0].mxu0 %v474_v8  ;;  %794 = vmatmul.mubr.f32.vlgmr.msra.gmra.mrb[0].mxu1 %v478_v10 }
 0x140   :  { %790 = vmatprep.mubr.f32.mxu0 %v475_v12  ;;  %796 = vmatprep.mubr.f32.mxu1 %v479_v14  ;;  %v653_v17 = vpop.permute.xlu1 %652  ;;  %v712_v12 = vstv %s1271_s6 }
 0x143   :  { %791 = vmatmul.mubr.f32.gmra.mrb[2].mxu0 %v476_v45  ;;  %797 = vmatmul.mubr.f32.gmra.mrb[2].mxu1 %v480_v15 }
 0x144   :  { %v512_v19 = vpop.permute.xlu1 %511 }
 0x148   :  { %v517_v21 = vpop.permute.xlu1 %516 }
 0x14c   :  { %v522_v27 = vpop.permute.xlu1 %521 }
 0x150   :  { %v527_v46 = vpop.permute.xlu1 %526 }
 0x154   :  { %v683_v60 = vpop.permute.xlu1 %682 }
 0x212   :  { %v789_v23 = vpop.f32.mrb[0].mxu0  ;;  %v795_v13 = vpop.f32.mrb[0].mxu1 }
 0x213   :  { %v601_v43 = vadd.f32 %v789_v23, %v497_v4  ;;  %v595_v24 = vpop.f32.mrb[1].mxu0  ;;  %v615_v25 = vpop.f32.mrb[1].mxu1  ;;  %v621_v38 = vadd.f32 %v795_v13, %v517_v21 }
 0x214   :  { %v596_v26 = vadd.f32 %v595_v24, %v492_v1  ;;  %v616_v35 = vadd.f32 %v615_v25, %v512_v19 }
 0x215   :  { %v635_v28 = vmax.f32 %v601_v43, 0.0  ;;  %v639_v48 = vmax.f32 %v621_v38, 0.0 }
 0x216   :  { %v634_v29 = vmax.f32 %v596_v26, 0.0  ;;  %v792_v7 = vpop.f32.mrb[2].mxu0  ;;  %v798_v53 = vpop.f32.mrb[2].mxu1  ;;  %v638_v42 = vmax.f32 %v616_v35, 0.0 }
 0x217   :  { %v691_v30 = vmul.f32 %v658_v18, %v635_v28  ;;  %v611_v31 = vadd.f32 %v792_v7, %v507_v11  ;;  %v605_v32 = vpop.f32.mrb[3].mxu0  ;;  %v625_v33 = vpop.f32.mrb[3].mxu1  ;;  %v631_v51 = vadd.f32 %v798_v53, %v527_v46  ;;  %v695_v56 = vmul.f32 %v678_v62, %v639_v48 }
 0x218   :  { %v690_v34 = vmul.f32 %v653_v17, %v634_v29  ;;  %v606_v36 = vadd.f32 %v605_v32, %v502_v16  ;;  %v626_v47 = vadd.f32 %v625_v33, %v522_v27  ;;  %v694_v52 = vmul.f32 %v673_v37, %v638_v42 }
 0x219   :  { %v637_v40 = vmax.f32 %v611_v31, 0.0  ;;  %v641_v58 = vmax.f32 %v631_v51, 0.0 }
 0x21a   :  { %v698_v39 = vadd.f32 %v691_v30, %v690_v34  ;;  %v636_v41 = vmax.f32 %v606_v36, 0.0  ;;  %v640_v55 = vmax.f32 %v626_v47, 0.0 }
 0x21b   :  { %v693_v50 = vmul.f32 %v668_v22, %v637_v40  ;;  %v697_v6 = vmul.f32 %v688_v5, %v641_v58 }
 0x21c   :  { %v692_v44 = vmul.f32 %v663_v20, %v636_v41  ;;  %v696_v61 = vmul.f32 %v683_v60, %v640_v55 }
 0x21e   :  { %v699_v57 = vadd.f32 %v698_v39, %v692_v44 }
 0x220   :  { %v700_v54 = vadd.f32 %v699_v57, %v693_v50 }
 0x222   :  { %v701_v59 = vadd.f32 %v700_v54, %v694_v52 }
 0x224   :  { %v702_v0 = vadd.f32 %v701_v59, %v695_v56 }
 0x226   :  { %v703_v2 = vadd.f32 %v702_v0, %v696_v61 }
 0x228   :  { %v704_v9 = vadd.f32 %v703_v2, %v697_v6 }
 0x22a   :  { %v705_v49 = vrot.slane %v704_v9, 4 }
 0x22c   :  { %v706_v63 = vadd.f32 %v705_v49, %v704_v9 }
 0x22e   :  { %v707_v3 = vrot.slane %v706_v63, 2 }
 0x230   :  { %v708_v8 = vadd.f32 %v707_v3, %v706_v63 }
 0x232   :  { %v709_v10 = vrot.slane %v708_v8, 1 }
 0x234   :  { %v710_v14 = vadd.f32 %v709_v10, %v708_v8 }
 0x236   :  { %v713_v45 = vadd.f32 %v712_v12, %v710_v14 }
 0x238   :  { %878 = vtanh.f32 %v713_v45 }
 0x242   :  { %v879_v15 = vpop.eup %878 }
 0x243   :  { %v715_v1 = vmul.f32 2.0, %v879_v15 }
 0x245   :  { %716 = vst [vmem:[#allocation3] sm:$0x1] %v715_v1 }
 0x246   :  { %891 = shalt.err (!%p888_p4)
}
 0x247   :  { %s892_s6 = scalar_lea.hbm %s1272_s7, 16 }
 0x248   :  { %p893_p5 = scmp.ne.s32.totalorder %s1272_s7, %s892_s6  ;;  %p896_p6 = scmp.lt.u32.totalorder %s892_s6, %s1272_s7 }
 0x24a   :  { %p898_p7 = pnand %p896_p6, %p893_p5 }
 0x24c   :  { %901 = shalt.err (!%p898_p7)
}
 0x24d   :  { %726 = dma.vmem_to_hbm [thread:$0]  %s724_s17, 16, %s1272_s7, [#allocation4]  }
 0x24e   :  { %902 = dma.done.wait [#allocation4], 16  }
 0x24f   :  { %903 = vsyncadd [#allocation4], 4294967280 }
 0x250   :  { %730 = vsyncpa [#allocation4], 1 }

</bundles_post_ra>
